<compile_context>
chip_gen: v7x
topology: tpu7x:2x2x1
jax: 0.10.0
libtpu: 0.0.40
codegen_flags: <defaults>
</compile_context>

<pallas_src>
import functools

import jax
import jax.numpy as jnp
from jax.experimental import pallas as pl
from jax.experimental.pallas import tpu as pltpu

HALO = 2      # two stacked k=3 depthwise convs -> +-2 rows of input context
HBLK = 8      # sublane-aligned halo fetch granule (rows)
LANE = 128    # TPU lane width


def _round_up(n, m):
    return ((n + m - 1) // m) * m


def _tpu_defaults():
    """(vmem_limit_bytes, tap_dtype) chosen per TPU generation."""
    try:
        kind = jax.devices()[0].device_kind.lower()
    except Exception:
        kind = ""
    is_v7 = "v7" in kind
    is_v5 = ("v5" in kind) or ("tpu" not in kind)
    # v7x: 64 MiB physical VMEM -> keep the 32 MiB scoped default.
    # v5e/v6e: 128 MiB physical -> allow larger tiles / scoped limit.
    vmem_limit = (32 if is_v7 else 64) * 1024 * 1024
    # bf16 VPU exists on v6e/v7x only; depthwise taps stay f32 on v5e.
    tap_dtype = jnp.float32 if is_v5 else jnp.bfloat16
    return vmem_limit, tap_dtype


def _choose_tile(L, cin_p, cout_p, in_bytes, out_bytes, tap_bytes, vmem_limit):
    """Largest multiple-of-8 L-tile whose per-step VMEM footprint fits the
    (generation-dependent) budget, so the same code works on v5e/v6e/v7x."""
    budget = int(vmem_limit * 0.6)          # leave pipelining headroom
    tl = min(_round_up(max(L, 8), 8), 2048)
    while True:
        need = (2 * tl * cin_p * in_bytes               # x block (double buffered)
                + 2 * tl * cout_p * out_bytes           # out block (double buffered)
                + (tl + 8) * cout_p * tap_bytes         # h1 scratch
                + (tl + 8) * cin_p * (tap_bytes + 2)    # xb + y1 values
                + tl * cout_p * 6                       # y2 + z2 values
                + 2 * 2 * (cin_p * cout_p + cout_p * cout_p))  # bf16 weights, 2 bufs
        if need <= budget or tl <= 8:
            break
        tl = max(8, _round_up(tl // 2, 8))
    return tl


def _block_kernel(x_ref, xl_ref, xr_ref,
                  dw1_ref, pw1_ref, b1_ref,
                  dw2_ref, pw2_ref, b2_ref,
                  out_ref, h1_ref, *, tl, seq_len, tap_dtype):
    """One (batch, L-tile) grid point.

    x_ref   : (TL, Cin_p)    rows [t*TL, (t+1)*TL) of the padded sequence
    xl_ref  : (8,  Cin_p)    the 8-row block ending at t*TL (left halo source)
    xr_ref  : (8,  Cin_p)    the 8-row block starting at (t+1)*TL (right halo)
    dw*_ref : (3,  C)  f32   depthwise taps (bias folded away)
    pw*_ref : (Cin, Cout) bf16  pointwise weights with BN scale folded in
    b*_ref  : (1,  Cout) f32    fused conv-bias + BN shift
    out_ref : (TL, Cout_p)
    h1_ref  : (TL+2, Cout_p) stage-1 activation scratch (tap_dtype)
    """
    t = pl.program_id(1)
    nt = pl.num_programs(1)
    is_first = t == 0
    is_last = t == nt - 1

    x = x_ref[...].astype(tap_dtype)
    # Halo rows come from neighbouring 8-row blocks of the same HBM array; on
    # boundary tiles the block index is clamped, so zero them there (this is
    # exactly PyTorch's zero padding of the input at the sequence edges).
    lmask = (~is_first).astype(tap_dtype)
    rmask = (~is_last).astype(tap_dtype)
    left = xl_ref[HBLK - HALO:HBLK, :].astype(tap_dtype) * lmask   # rows t*TL-2, -1
    right = xr_ref[0:HALO, :].astype(tap_dtype) * rmask            # rows t*TL+TL, +1
    # VMEM-only assembly of the haloed window (no extra HBM traffic).
    xb = jnp.concatenate([left, x, right], axis=0)                 # (TL+4, Cin_p)

    # ---- stage 1: depthwise k=3 over global rows [t*TL-1, t*TL+TL+1) --------
    w1 = dw1_ref[...].astype(tap_dtype)
    y1 = (xb[0:tl + 2, :] * w1[0:1, :]
          + xb[1:tl + 3, :] * w1[1:2, :]
          + xb[2:tl + 4, :] * w1[2:3, :])                          # (TL+2, Cin_p)
    z1 = jnp.dot(y1.astype(jnp.bfloat16), pw1_ref[...],
                 preferred_element_type=jnp.float32) + b1_ref[...]
    h1_ref[...] = jnp.maximum(z1, 0.0).astype(h1_ref.dtype)        # (TL+2, Cout_p)

    # PyTorch zero-pads the *intermediate* activation for the second depthwise
    # conv.  Rows outside [0, L) exist only on boundary tiles, so only those
    # tiles pay for the masking (interior tiles skip it entirely).
    @pl.when(is_first)
    def _():
        h1_ref[0:1, :] = jnp.zeros((1, h1_ref.shape[1]), h1_ref.dtype)

    @pl.when(is_last)
    def _():
        rows = t * tl - 1 + jax.lax.broadcasted_iota(jnp.int32, (tl + 2, 1), 0)
        h = h1_ref[...]
        h1_ref[...] = jnp.where(rows < seq_len, h, jnp.zeros_like(h))

    # ---- stage 2: depthwise k=3 over the TL output rows ----------------------
    w2 = dw2_ref[...].astype(tap_dtype)
    y2 = (h1_ref[0:tl, :] * w2[0:1, :]
          + h1_ref[1:tl + 1, :] * w2[1:2, :]
          + h1_ref[2:tl + 2, :] * w2[2:3, :])                      # (TL, Cout_p)
    z2 = jnp.dot(y2.astype(jnp.bfloat16), pw2_ref[...],
                 preferred_element_type=jnp.float32) + b2_ref[...]
    out_ref[...] = jnp.maximum(z2, 0.0).astype(out_ref.dtype)

    # Zero the padded tail rows of the last tile so the padded-NLC output is
    # directly chainable into the next Block without a cleanup pass.
    @pl.when(is_last)
    def _():
        rows = t * tl + jax.lax.broadcasted_iota(jnp.int32, (tl, 1), 0)
        o = out_ref[...]
        out_ref[...] = jnp.where(rows < seq_len, o, jnp.zeros_like(o))
    # TODO(synk): dropout (p=0.1) is identity in eval mode; training-mode RNG
    # dropout and training-mode BatchNorm statistics are intentionally not
    # emulated.


def block_apply_nlc(x_nlc, kparams, *, seq_len, tile_l=None,
                    out_dtype=jnp.bfloat16, tap_dtype=None, vmem_limit=None):
    """Fast path.  x_nlc: (B, L_pad, Cin_p) lane-dense NLC with L_pad % TL == 0
    and rows >= seq_len zeroed.  Returns (B, L_pad, Cout_p) in out_dtype with
    padded rows zeroed, so consecutive Blocks chain with no layout work."""
    dflt_vmem, dflt_tap = _tpu_defaults()
    vmem_limit = dflt_vmem if vmem_limit is None else vmem_limit
    tap_dtype = dflt_tap if tap_dtype is None else tap_dtype

    B, L_pad, cin_p = x_nlc.shape
    cin_w, cout_p = kparams["pw1_w"].shape
    assert cin_w == cin_p and cin_p % LANE == 0 and cout_p % LANE == 0

    in_bytes = x_nlc.dtype.itemsize
    out_bytes = jnp.dtype(out_dtype).itemsize
    tap_bytes = jnp.dtype(tap_dtype).itemsize
    if tile_l is None:
        tile_l = _choose_tile(seq_len, cin_p, cout_p, in_bytes, out_bytes,
                              tap_bytes, vmem_limit)
    TL = _round_up(min(tile_l, L_pad), 8)
    assert L_pad % TL == 0 and L_pad - seq_len < TL
    nt = L_pad // TL
    blk = TL // HBLK          # 8-row blocks per tile
    nlb = L_pad // HBLK       # total 8-row blocks along L

    p_names = ("dw1_w", "pw1_w", "b1", "dw2_w", "pw2_w", "b2")
    p_arrays = [kparams[k] for k in p_names]

    def rep_spec(arr):
        nd = arr.ndim
        return pl.BlockSpec(arr.shape, lambda b, t, _nd=nd: (0,) * _nd)

    # Halo block indices use clamp-by-arithmetic (no data-dependent branches):
    #   left : max(t*blk - 1, 0)          right : min((t+1)*blk, nlb - 1)
    left_spec = pl.BlockSpec(
        (None, HBLK, cin_p), lambda b, t: (b, t * blk - (t > 0), 0))
    right_spec = pl.BlockSpec(
        (None, HBLK, cin_p), lambda b, t: (b, (t + 1) * blk - (t == nt - 1), 0))

    flops = int(2 * B * L_pad * (cin_p * cout_p + cout_p * cout_p)
                + 10 * B * L_pad * (cin_p + cout_p))
    bytes_accessed = int(B * L_pad * cin_p * in_bytes
                         + B * nt * 2 * HBLK * cin_p * in_bytes
                         + B * L_pad * cout_p * out_bytes
                         + sum(int(p.size) * p.dtype.itemsize for p in p_arrays))

    return pl.pallas_call(
        functools.partial(_block_kernel, tl=TL, seq_len=seq_len,
                          tap_dtype=tap_dtype),
        out_shape=jax.ShapeDtypeStruct((B, L_pad, cout_p), out_dtype),
        grid_spec=pltpu.PrefetchScalarGridSpec(
            num_scalar_prefetch=0,
            grid=(B, nt),
            in_specs=[
                pl.BlockSpec((None, TL, cin_p), lambda b, t: (b, t, 0)),
                left_spec,
                right_spec,
            ] + [rep_spec(p) for p in p_arrays],
            out_specs=pl.BlockSpec((None, TL, cout_p), lambda b, t: (b, t, 0)),
            scratch_shapes=[pltpu.VMEM((TL + 2, cout_p), tap_dtype)],
        ),
        compiler_params=pltpu.CompilerParams(
            # Both axes independent -> megacore (v7x 2-TC) can shard either.
            dimension_semantics=("parallel", "parallel"),
            vmem_limit_bytes=vmem_limit),
        cost_estimate=pl.CostEstimate(
            flops=flops, transcendentals=0, bytes_accessed=bytes_accessed),
    )(x_nlc, x_nlc, x_nlc, *p_arrays)


# --------------------------- one-time layout helpers -------------------------
def ncl_to_padded_nlc(x_ncl, cin_p, tile_l, dtype=jnp.bfloat16):
    """One-time conversion (hoist to WNet entry in a full model):
    (B, C, L) NCL f32 -> (B, L_pad, Cin_p) lane-dense, zero-padded NLC."""
    B, C, L = x_ncl.shape
    nt = -(-L // tile_l)
    L_pad = nt * tile_l
    x = jnp.transpose(x_ncl, (0, 2, 1))
    x = jnp.pad(x, ((0, 0), (0, L_pad - L), (0, cin_p - C)))
    return x.astype(dtype)


def padded_nlc_to_ncl(y_nlc, out_filters, seq_len, dtype=jnp.float32):
    """One-time conversion back to PyTorch NCL (hoist to WNet exit)."""
    return jnp.transpose(y_nlc[:, :seq_len, :out_filters], (0, 2, 1)).astype(dtype)


def block_forward(x_ncl, kparams, out_filters, *, tile_l=None):
    """Demo wrapper with PyTorch NCL layout at both ends.  In a full WNet the
    two layout conversions below run once per network, not once per Block."""
    dflt_vmem, dflt_tap = _tpu_defaults()
    B, C_in, L = x_ncl.shape
    cin_p, cout_p = kparams["pw1_w"].shape
    if tile_l is None:
        tile_l = _choose_tile(L, cin_p, cout_p, 2, 2,
                              jnp.dtype(dflt_tap).itemsize, dflt_vmem)
    TL = _round_up(min(tile_l, _round_up(L, 8)), 8)
    x = ncl_to_padded_nlc(x_ncl, cin_p, TL, dtype=jnp.bfloat16)
    y = block_apply_nlc(x, kparams, seq_len=L, tile_l=TL)
    return padded_nlc_to_ncl(y, out_filters, L)


# --------------------------- parameters & reference --------------------------
def init_raw_params(key, in_filters, out_filters):
    """Synthetic parameters with PyTorch Block shapes (eval-mode BN stats)."""
    ks = jax.random.split(key, 12)
    raw = {
        # spatial1: Conv1d(in, in, k=3, groups=in): weight (in,1,3) -> (in,3)
        "dw1_w": 0.3 * jax.random.normal(ks[0], (in_filters, 3), jnp.float32),
        "dw1_b": 0.1 * jax.random.normal(ks[1], (in_filters,), jnp.float32),
        # depth1: Conv1d(in, out, k=1): weight (out,in,1) -> (out,in)
        "pw1_w": 0.3 * jax.random.normal(ks[2], (out_filters, in_filters), jnp.float32),
        "pw1_b": 0.1 * jax.random.normal(ks[3], (out_filters,), jnp.float32),
        "dw2_w": 0.3 * jax.random.normal(ks[4], (out_filters, 3), jnp.float32),
        "dw2_b": 0.1 * jax.random.normal(ks[5], (out_filters,), jnp.float32),
        "pw2_w": 0.3 * jax.random.normal(ks[6], (out_filters, out_filters), jnp.float32),
        "pw2_b": 0.1 * jax.random.normal(ks[7], (out_filters,), jnp.float32),
        "bn1_g": 1.0 + 0.1 * jax.random.normal(ks[8], (out_filters,), jnp.float32),
        "bn1_b": 0.1 * jax.random.normal(ks[9], (out_filters,), jnp.float32),
        "bn1_rm": 0.05 * jax.random.normal(ks[10], (out_filters,), jnp.float32),
        "bn1_rv": jnp.abs(1.0 + 0.1 * jax.random.normal(ks[11], (out_filters,), jnp.float32)),
    }
    raw["bn2_g"] = raw["bn1_g"] * 0.9 + 0.05
    raw["bn2_b"] = raw["bn1_b"] * 1.1 - 0.02
    raw["bn2_rm"] = raw["bn1_rm"] * 0.5
    raw["bn2_rv"] = raw["bn1_rv"] * 1.2
    return raw


def fold_params(raw, eps=1e-5, lane=LANE):
    """Fold BN scale into pointwise weights, all biases into one shift, pad
    channels to a lane-dense multiple of 128, cast matmul weights to bf16."""
    in_filters = raw["dw1_w"].shape[0]
    out_filters = raw["dw2_w"].shape[0]
    cin_p = _round_up(in_filters, lane)
    cout_p = _round_up(out_filters, lane)

    def fold(dw_w, dw_b, pw_w, pw_b, g, beta, rm, rv, cin, cin_pad, cout_pad):
        scale = g / jnp.sqrt(rv + eps)
        shift = beta - rm * scale
        W = pw_w.T * scale[None, :]                      # (cin, cout)
        b = (pw_b + dw_b @ pw_w.T) * scale + shift       # (cout,)
        dw = dw_w.T                                      # (3, cin)
        return (
            jnp.pad(dw, ((0, 0), (0, cin_pad - cin))),
            jnp.pad(W, ((0, cin_pad - cin),
                        (0, cout_pad - W.shape[1]))).astype(jnp.bfloat16),
            jnp.pad(b, (0, cout_pad - b.shape[0])).reshape(1, -1),
        )

    dw1, W1, b1 = fold(raw["dw1_w"], raw["dw1_b"], raw["pw1_w"], raw["pw1_b"],
                       raw["bn1_g"], raw["bn1_b"], raw["bn1_rm"], raw["bn1_rv"],
                       in_filters, cin_p, cout_p)
    dw2, W2, b2 = fold(raw["dw2_w"], raw["dw2_b"], raw["pw2_w"], raw["pw2_b"],
                       raw["bn2_g"], raw["bn2_b"], raw["bn2_rm"], raw["bn2_rv"],
                       out_filters, cout_p, cout_p)
    return {"dw1_w": dw1, "pw1_w": W1, "b1": b1,
            "dw2_w": dw2, "pw2_w": W2, "b2": b2}


def _reference(x_ncl, raw, eps=1e-5):
    """Pure-JAX mirror of Block.forward (eval), unfolded f32 parameters."""
    x = jnp.transpose(x_ncl, (0, 2, 1))

    def stage(h, dw_w, dw_b, pw_w, pw_b, g, beta, rm, rv):
        hp = jnp.pad(h, ((0, 0), (1, 1), (0, 0)))
        y = (hp[:, :-2, :] * dw_w[:, 0] + hp[:, 1:-1, :] * dw_w[:, 1]
             + hp[:, 2:, :] * dw_w[:, 2] + dw_b)
        z = jnp.einsum("blc,oc->blo", y, pw_w) + pw_b
        z = (z - rm) / jnp.sqrt(rv + eps) * g + beta
        return jnp.maximum(jnp.maximum(z, 0.0), 0.0)   # clamp(0) then ReLU

    h = stage(x, raw["dw1_w"], raw["dw1_b"], raw["pw1_w"], raw["pw1_b"],
              raw["bn1_g"], raw["bn1_b"], raw["bn1_rm"], raw["bn1_rv"])
    h = stage(h, raw["dw2_w"], raw["dw2_b"], raw["pw2_w"], raw["pw2_b"],
              raw["bn2_g"], raw["bn2_b"], raw["bn2_rm"], raw["bn2_rv"])
    return jnp.transpose(h, (0, 2, 1))


if __name__ == "__main__":
    key = jax.random.PRNGKey(0)
    kx, kp, kx2 = jax.random.split(key, 3)

    # Small shapes consistent with the module: batch=2, in=4, out=8, seq=16.
    B, C_in, C_out, L = 2, 4, 8, 16
    raw = init_raw_params(kp, C_in, C_out)
    kparams = fold_params(raw)

    x = jax.random.normal(kx, (B, C_in, L), jnp.float32)      # PyTorch NCL
    out = jax.block_until_ready(block_forward(x, kparams, C_out))
    ref = _reference(x, raw)
    assert out.shape == (B, C_out, L)
    # bf16 input/output + bf16 MXU operands (f32 accumulation) vs. exact-f32
    # PyTorch-equivalent reference -> loosened tolerance.
    err = float(jnp.max(jnp.abs(out - ref)))
    assert jnp.allclose(out, ref, atol=5e-2, rtol=5e-2), err

    # Multi-tile path: L=40 spans 3 tiles of 16 -> exercises neighbour-block
    # halos, interior (mask-free) tiles and padded-tail zeroing.
    x2 = jax.random.normal(kx2, (B, C_in, 40), jnp.float32)
    out2 = jax.block_until_ready(block_forward(x2, kparams, C_out, tile_l=16))
    ref2 = _reference(x2, raw)
    assert out2.shape == (B, C_out, 40)
    err2 = float(jnp.max(jnp.abs(out2 - ref2)))
    assert jnp.allclose(out2, ref2, atol=5e-2, rtol=5e-2), err2

    print("KERNEL_OK")
</pallas_src>

<mosaic_0001>
module attributes {stable_mosaic.version = 11 : i64} {
  func.func @_block_kernel(%arg0: i32, %arg1: i32, %arg2: memref<1x16x128xbf16, #tpu.memory_space<vmem>>, %arg3: memref<1x8x128xbf16, #tpu.memory_space<vmem>>, %arg4: memref<1x8x128xbf16, #tpu.memory_space<vmem>>, %arg5: memref<3x128xf32, #tpu.memory_space<vmem>>, %arg6: memref<128x128xbf16, #tpu.memory_space<vmem>>, %arg7: memref<1x128xf32, #tpu.memory_space<vmem>>, %arg8: memref<3x128xf32, #tpu.memory_space<vmem>>, %arg9: memref<128x128xbf16, #tpu.memory_space<vmem>>, %arg10: memref<1x128xf32, #tpu.memory_space<vmem>>, %arg11: memref<1x16x128xbf16, #tpu.memory_space<vmem>>, %arg12: memref<18x128xf32, #tpu.memory_space<vmem>>) attributes {dimension_semantics = [#tpu.dimension_semantics<parallel>, #tpu.dimension_semantics<parallel>], iteration_bounds = array<i64: 2, 1>, scalar_prefetch = 0 : i64, scratch_operands = 1 : i64, tpu.core_type = #tpu.core_type<tc>, window_params = [{transform_indices = @transform_0, window_bounds = array<i64: 1, 16, 128>}, {transform_indices = @transform_1, window_bounds = array<i64: 1, 8, 128>}, {transform_indices = @transform_2, window_bounds = array<i64: 1, 8, 128>}, {pipeline_mode = #tpu.pipeline_mode<synchronous>, transform_indices = @transform_3, window_bounds = array<i64: 3, 128>}, {pipeline_mode = #tpu.pipeline_mode<synchronous>, transform_indices = @transform_4, window_bounds = array<i64: 128, 128>}, {pipeline_mode = #tpu.pipeline_mode<synchronous>, transform_indices = @transform_5, window_bounds = array<i64: 1, 128>}, {pipeline_mode = #tpu.pipeline_mode<synchronous>, transform_indices = @transform_6, window_bounds = array<i64: 3, 128>}, {pipeline_mode = #tpu.pipeline_mode<synchronous>, transform_indices = @transform_7, window_bounds = array<i64: 128, 128>}, {pipeline_mode = #tpu.pipeline_mode<synchronous>, transform_indices = @transform_8, window_bounds = array<i64: 1, 128>}, {transform_indices = @transform_9, window_bounds = array<i64: 1, 16, 128>}]} {
    %c0_i32 = arith.constant 0 : i32
    %0 = arith.cmpi eq, %arg1, %c0_i32 : i32
    %c0_i32_0 = arith.constant 0 : i32
    %1 = arith.cmpi eq, %arg1, %c0_i32_0 : i32
    %c0 = arith.constant 0 : index
    %c0_1 = arith.constant 0 : index
    %c0_2 = arith.constant 0 : index
    %2 = vector.load %arg2[%c0, %c0_1, %c0_2] : memref<1x16x128xbf16, #tpu.memory_space<vmem>>, vector<1x16x128xbf16>
    %3 = vector.shape_cast %2 : vector<1x16x128xbf16> to vector<16x128xbf16>
    %4 = arith.extf %3 : vector<16x128xbf16> to vector<16x128xf32>
    %true = arith.constant true
    %5 = arith.xori %0, %true : i1
    %6 = arith.extui %5 : i1 to i32
    %7 = arith.sitofp %6 : i32 to f32
    %true_3 = arith.constant true
    %8 = arith.xori %1, %true_3 : i1
    %9 = arith.extui %8 : i1 to i32
    %10 = arith.sitofp %9 : i32 to f32
    %c0_4 = arith.constant 0 : index
    %c6 = arith.constant 6 : index
    %c0_5 = arith.constant 0 : index
    %11 = vector.load %arg3[%c0_4, %c6, %c0_5] : memref<1x8x128xbf16, #tpu.memory_space<vmem>>, vector<1x2x128xbf16>
    %12 = vector.shape_cast %11 : vector<1x2x128xbf16> to vector<2x128xbf16>
    %13 = arith.extf %12 : vector<2x128xbf16> to vector<2x128xf32>
    %14 = vector.broadcast %7 : f32 to vector<2x128xf32>
    %15 = arith.mulf %13, %14 : vector<2x128xf32>
    %c0_6 = arith.constant 0 : index
    %c0_7 = arith.constant 0 : index
    %c0_8 = arith.constant 0 : index
    %16 = vector.load %arg4[%c0_6, %c0_7, %c0_8] : memref<1x8x128xbf16, #tpu.memory_space<vmem>>, vector<1x2x128xbf16>
    %17 = vector.shape_cast %16 : vector<1x2x128xbf16> to vector<2x128xbf16>
    %18 = arith.extf %17 : vector<2x128xbf16> to vector<2x128xf32>
    %19 = vector.broadcast %10 : f32 to vector<2x128xf32>
    %20 = arith.mulf %18, %19 : vector<2x128xf32>
    %21 = tpu.concatenate %15, %4, %20 in 0 : vector<2x128xf32>, vector<16x128xf32>, vector<2x128xf32> -> vector<20x128xf32>
    %c0_9 = arith.constant 0 : index
    %c0_10 = arith.constant 0 : index
    %22 = vector.load %arg5[%c0_9, %c0_10] : memref<3x128xf32, #tpu.memory_space<vmem>>, vector<3x128xf32>
    %23 = vector.extract_strided_slice %21 {offsets = [0, 0], sizes = [18, 128], strides = [1, 1]} : vector<20x128xf32> to vector<18x128xf32>
    %24 = vector.extract_strided_slice %22 {offsets = [0, 0], sizes = [1, 128], strides = [1, 1]} : vector<3x128xf32> to vector<1x128xf32>
    %25 = vector.broadcast %24 : vector<1x128xf32> to vector<18x128xf32>
    %26 = arith.mulf %23, %25 : vector<18x128xf32>
    %27 = vector.extract_strided_slice %21 {offsets = [1, 0], sizes = [18, 128], strides = [1, 1]} : vector<20x128xf32> to vector<18x128xf32>
    %28 = vector.extract_strided_slice %22 {offsets = [1, 0], sizes = [1, 128], strides = [1, 1]} : vector<3x128xf32> to vector<1x128xf32>
    %29 = vector.broadcast %28 : vector<1x128xf32> to vector<18x128xf32>
    %30 = arith.mulf %27, %29 : vector<18x128xf32>
    %31 = arith.addf %26, %30 : vector<18x128xf32>
    %32 = vector.extract_strided_slice %21 {offsets = [2, 0], sizes = [18, 128], strides = [1, 1]} : vector<20x128xf32> to vector<18x128xf32>
    %33 = vector.extract_strided_slice %22 {offsets = [2, 0], sizes = [1, 128], strides = [1, 1]} : vector<3x128xf32> to vector<1x128xf32>
    %34 = vector.broadcast %33 : vector<1x128xf32> to vector<18x128xf32>
    %35 = arith.mulf %32, %34 : vector<18x128xf32>
    %36 = arith.addf %31, %35 : vector<18x128xf32>
    %37 = arith.truncf %36 : vector<18x128xf32> to vector<18x128xbf16>
    %c0_11 = arith.constant 0 : index
    %c0_12 = arith.constant 0 : index
    %38 = vector.load %arg6[%c0_11, %c0_12] : memref<128x128xbf16, #tpu.memory_space<vmem>>, vector<128x128xbf16>
    %cst = arith.constant dense<0.000000e+00> : vector<18x128xf32>
    %39 = tpu.matmul %37, %38, %cst {dimension_numbers = #tpu.dot_dimension_numbers<[1], [0], [0], [1], [0, 0, 1, 1], [], []>} : vector<18x128xbf16>, vector<128x128xbf16>, vector<18x128xf32> -> vector<18x128xf32>
    %c0_13 = arith.constant 0 : index
    %c0_14 = arith.constant 0 : index
    %40 = vector.load %arg7[%c0_13, %c0_14] : memref<1x128xf32, #tpu.memory_space<vmem>>, vector<1x128xf32>
    %41 = vector.broadcast %40 : vector<1x128xf32> to vector<18x128xf32>
    %42 = arith.addf %39, %41 : vector<18x128xf32>
    %cst_15 = arith.constant 0.000000e+00 : f32
    %43 = vector.broadcast %cst_15 : f32 to vector<18x128xf32>
    %44 = arith.maximumf %42, %43 : vector<18x128xf32>
    %c0_16 = arith.constant 0 : index
    %c0_17 = arith.constant 0 : index
    %45 = vector.load %arg12[%c0_16, %c0_17] : memref<18x128xf32, #tpu.memory_space<vmem>>, vector<18x128xf32>
    tpu.vector_store %arg12[%c0_16, %c0_17], %44 {strides = array<i32>} : memref<18x128xf32, #tpu.memory_space<vmem>>, vector<18x128xf32>,
    %46 = arith.extui %0 : i1 to i32
    %c0_i32_18 = arith.constant 0 : i32
    %47 = arith.cmpi ne, %46, %c0_i32_18 : i32
    scf.if %47 {
      %cst_36 = arith.constant 0.000000e+00 : f32
      %79 = vector.broadcast %cst_36 : f32 to vector<1x128xf32>
      %c0_37 = arith.constant 0 : index
      %c0_38 = arith.constant 0 : index
      %80 = vector.load %arg12[%c0_37, %c0_38] : memref<18x128xf32, #tpu.memory_space<vmem>>, vector<1x128xf32>
      tpu.vector_store %arg12[%c0_37, %c0_38], %79 {strides = array<i32>} : memref<18x128xf32, #tpu.memory_space<vmem>>, vector<1x128xf32>,
    } else {
    }
    %48 = arith.extui %1 : i1 to i32
    %c0_i32_19 = arith.constant 0 : i32
    %49 = arith.cmpi ne, %48, %c0_i32_19 : i32
    scf.if %49 {
      %c16_i32 = arith.constant 16 : i32
      %79 = arith.muli %arg1, %c16_i32 : i32
      %c1_i32 = arith.constant 1 : i32
      %80 = arith.subi %79, %c1_i32 : i32
      %81 = tpu.iota {dimensions = array<i32: 0>} : vector<18x1xi32>
      %82 = vector.broadcast %80 : i32 to vector<18x1xi32>
      %83 = arith.addi %82, %81 : vector<18x1xi32>
      %c0_36 = arith.constant 0 : index
      %c0_37 = arith.constant 0 : index
      %84 = vector.load %arg12[%c0_36, %c0_37] : memref<18x128xf32, #tpu.memory_space<vmem>>, vector<18x128xf32>
      %c16_i32_38 = arith.constant 16 : i32
      %85 = vector.broadcast %c16_i32_38 : i32 to vector<18x1xi32>
      %86 = arith.cmpi slt, %83, %85 : vector<18x1xi32>
      %cst_39 = arith.constant 0.000000e+00 : f32
      %87 = vector.broadcast %cst_39 : f32 to vector<18x128xf32>
      %88 = vector.shape_cast %86 : vector<18x1xi1> to vector<18x1xi1>
      %89 = vector.broadcast %88 : vector<18x1xi1> to vector<18x128xi1>
      %90 = arith.select %89, %84, %87 : vector<18x128xi1>, vector<18x128xf32>
      %c0_40 = arith.constant 0 : index
      %c0_41 = arith.constant 0 : index
      %91 = vector.load %arg12[%c0_40, %c0_41] : memref<18x128xf32, #tpu.memory_space<vmem>>, vector<18x128xf32>
      tpu.vector_store %arg12[%c0_40, %c0_41], %90 {strides = array<i32>} : memref<18x128xf32, #tpu.memory_space<vmem>>, vector<18x128xf32>,
    } else {
    }
    %c0_20 = arith.constant 0 : index
    %c0_21 = arith.constant 0 : index
    %50 = vector.load %arg8[%c0_20, %c0_21] : memref<3x128xf32, #tpu.memory_space<vmem>>, vector<3x128xf32>
    %c0_22 = arith.constant 0 : index
    %c0_23 = arith.constant 0 : index
    %51 = vector.load %arg12[%c0_22, %c0_23] : memref<18x128xf32, #tpu.memory_space<vmem>>, vector<16x128xf32>
    %52 = vector.extract_strided_slice %50 {offsets = [0, 0], sizes = [1, 128], strides = [1, 1]} : vector<3x128xf32> to vector<1x128xf32>
    %53 = vector.broadcast %52 : vector<1x128xf32> to vector<16x128xf32>
    %54 = arith.mulf %51, %53 : vector<16x128xf32>
    %c1 = arith.constant 1 : index
    %c0_24 = arith.constant 0 : index
    %55 = vector.load %arg12[%c1, %c0_24] : memref<18x128xf32, #tpu.memory_space<vmem>>, vector<16x128xf32>
    %56 = vector.extract_strided_slice %50 {offsets = [1, 0], sizes = [1, 128], strides = [1, 1]} : vector<3x128xf32> to vector<1x128xf32>
    %57 = vector.broadcast %56 : vector<1x128xf32> to vector<16x128xf32>
    %58 = arith.mulf %55, %57 : vector<16x128xf32>
    %59 = arith.addf %54, %58 : vector<16x128xf32>
    %c2 = arith.constant 2 : index
    %c0_25 = arith.constant 0 : index
    %60 = vector.load %arg12[%c2, %c0_25] : memref<18x128xf32, #tpu.memory_space<vmem>>, vector<16x128xf32>
    %61 = vector.extract_strided_slice %50 {offsets = [2, 0], sizes = [1, 128], strides = [1, 1]} : vector<3x128xf32> to vector<1x128xf32>
    %62 = vector.broadcast %61 : vector<1x128xf32> to vector<16x128xf32>
    %63 = arith.mulf %60, %62 : vector<16x128xf32>
    %64 = arith.addf %59, %63 : vector<16x128xf32>
    %65 = arith.truncf %64 : vector<16x128xf32> to vector<16x128xbf16>
    %c0_26 = arith.constant 0 : index
    %c0_27 = arith.constant 0 : index
    %66 = vector.load %arg9[%c0_26, %c0_27] : memref<128x128xbf16, #tpu.memory_space<vmem>>, vector<128x128xbf16>
    %cst_28 = arith.constant dense<0.000000e+00> : vector<16x128xf32>
    %67 = tpu.matmul %65, %66, %cst_28 {dimension_numbers = #tpu.dot_dimension_numbers<[1], [0], [0], [1], [0, 0, 1, 1], [], []>} : vector<16x128xbf16>, vector<128x128xbf16>, vector<16x128xf32> -> vector<16x128xf32>
    %c0_29 = arith.constant 0 : index
    %c0_30 = arith.constant 0 : index
    %68 = vector.load %arg10[%c0_29, %c0_30] : memref<1x128xf32, #tpu.memory_space<vmem>>, vector<1x128xf32>
    %69 = vector.broadcast %68 : vector<1x128xf32> to vector<16x128xf32>
    %70 = arith.addf %67, %69 : vector<16x128xf32>
    %cst_31 = arith.constant 0.000000e+00 : f32
    %71 = vector.broadcast %cst_31 : f32 to vector<16x128xf32>
    %72 = arith.maximumf %70, %71 : vector<16x128xf32>
    %73 = arith.truncf %72 : vector<16x128xf32> to vector<16x128xbf16>
    %c0_32 = arith.constant 0 : index
    %c0_33 = arith.constant 0 : index
    %c0_34 = arith.constant 0 : index
    %74 = vector.load %arg11[%c0_32, %c0_33, %c0_34] : memref<1x16x128xbf16, #tpu.memory_space<vmem>>, vector<1x16x128xbf16>
    %75 = vector.shape_cast %74 : vector<1x16x128xbf16> to vector<16x128xbf16>
    %76 = vector.shape_cast %73 : vector<16x128xbf16> to vector<1x16x128xbf16>
    tpu.vector_store %arg11[%c0_32, %c0_33, %c0_34], %76 {strides = array<i32>} : memref<1x16x128xbf16, #tpu.memory_space<vmem>>, vector<1x16x128xbf16>,
    %77 = arith.extui %1 : i1 to i32
    %c0_i32_35 = arith.constant 0 : i32
    %78 = arith.cmpi ne, %77, %c0_i32_35 : i32
    scf.if %78 {
      %c16_i32 = arith.constant 16 : i32
      %79 = arith.muli %arg1, %c16_i32 : i32
      %80 = tpu.iota {dimensions = array<i32: 0>} : vector<16x1xi32>
      %81 = vector.broadcast %79 : i32 to vector<16x1xi32>
      %82 = arith.addi %81, %80 : vector<16x1xi32>
      %c0_36 = arith.constant 0 : index
      %c0_37 = arith.constant 0 : index
      %c0_38 = arith.constant 0 : index
      %83 = vector.load %arg11[%c0_36, %c0_37, %c0_38] : memref<1x16x128xbf16, #tpu.memory_space<vmem>>, vector<1x16x128xbf16>
      %84 = vector.shape_cast %83 : vector<1x16x128xbf16> to vector<16x128xbf16>
      %c16_i32_39 = arith.constant 16 : i32
      %85 = vector.broadcast %c16_i32_39 : i32 to vector<16x1xi32>
      %86 = arith.cmpi slt, %82, %85 : vector<16x1xi32>
      %cst_40 = arith.constant 0.000000e+00 : bf16
      %87 = vector.broadcast %cst_40 : bf16 to vector<16x128xbf16>
      %88 = vector.shape_cast %86 : vector<16x1xi1> to vector<16x1xi1>
      %89 = vector.broadcast %88 : vector<16x1xi1> to vector<16x128xi1>
      %90 = arith.select %89, %84, %87 : vector<16x128xi1>, vector<16x128xbf16>
      %c0_41 = arith.constant 0 : index
      %c0_42 = arith.constant 0 : index
      %c0_43 = arith.constant 0 : index
      %91 = vector.load %arg11[%c0_41, %c0_42, %c0_43] : memref<1x16x128xbf16, #tpu.memory_space<vmem>>, vector<1x16x128xbf16>
      %92 = vector.shape_cast %91 : vector<1x16x128xbf16> to vector<16x128xbf16>
      %93 = vector.shape_cast %90 : vector<16x128xbf16> to vector<1x16x128xbf16>
      tpu.vector_store %arg11[%c0_41, %c0_42, %c0_43], %93 {strides = array<i32>} : memref<1x16x128xbf16, #tpu.memory_space<vmem>>, vector<1x16x128xbf16>,
    } else {
    }
    return
  }
  func.func @transform_0(%arg0: i32, %arg1: i32) -> (i32, i32, i32) {
    %c0_i32 = arith.constant 0 : i32
    %c0_i32_0 = arith.constant 0 : i32
    return %arg0, %arg1, %c0_i32 : i32, i32, i32
  }
  func.func @transform_1(%arg0: i32, %arg1: i32) -> (i32, i32, i32) {
    %c2_i32 = arith.constant 2 : i32
    %0 = arith.muli %arg1, %c2_i32 : i32
    %c0_i32 = arith.constant 0 : i32
    %1 = arith.cmpi sgt, %arg1, %c0_i32 : i32
    %2 = arith.extui %1 : i1 to i32
    %3 = arith.subi %0, %2 : i32
    %c0_i32_0 = arith.constant 0 : i32
    %c0_i32_1 = arith.constant 0 : i32
    return %arg0, %3, %c0_i32_0 : i32, i32, i32
  }
  func.func @transform_2(%arg0: i32, %arg1: i32) -> (i32, i32, i32) {
    %c1_i32 = arith.constant 1 : i32
    %0 = arith.addi %arg1, %c1_i32 : i32
    %c2_i32 = arith.constant 2 : i32
    %1 = arith.muli %0, %c2_i32 : i32
    %c0_i32 = arith.constant 0 : i32
    %2 = arith.cmpi eq, %arg1, %c0_i32 : i32
    %3 = arith.extui %2 : i1 to i32
    %4 = arith.subi %1, %3 : i32
    %c0_i32_0 = arith.constant 0 : i32
    %c0_i32_1 = arith.constant 0 : i32
    return %arg0, %4, %c0_i32_0 : i32, i32, i32
  }
  func.func @transform_3(%arg0: i32, %arg1: i32) -> (i32, i32) {
    %c0_i32 = arith.constant 0 : i32
    %c0_i32_0 = arith.constant 0 : i32
    %c0_i32_1 = arith.constant 0 : i32
    return %c0_i32, %c0_i32_0 : i32, i32
  }
  func.func @transform_4(%arg0: i32, %arg1: i32) -> (i32, i32) {
    %c0_i32 = arith.constant 0 : i32
    %c0_i32_0 = arith.constant 0 : i32
    %c0_i32_1 = arith.constant 0 : i32
    return %c0_i32, %c0_i32_0 : i32, i32
  }
  func.func @transform_5(%arg0: i32, %arg1: i32) -> (i32, i32) {
    %c0_i32 = arith.constant 0 : i32
    %c0_i32_0 = arith.constant 0 : i32
    %c0_i32_1 = arith.constant 0 : i32
    return %c0_i32, %c0_i32_0 : i32, i32
  }
  func.func @transform_6(%arg0: i32, %arg1: i32) -> (i32, i32) {
    %c0_i32 = arith.constant 0 : i32
    %c0_i32_0 = arith.constant 0 : i32
    %c0_i32_1 = arith.constant 0 : i32
    return %c0_i32, %c0_i32_0 : i32, i32
  }
  func.func @transform_7(%arg0: i32, %arg1: i32) -> (i32, i32) {
    %c0_i32 = arith.constant 0 : i32
    %c0_i32_0 = arith.constant 0 : i32
    %c0_i32_1 = arith.constant 0 : i32
    return %c0_i32, %c0_i32_0 : i32, i32
  }
  func.func @transform_8(%arg0: i32, %arg1: i32) -> (i32, i32) {
    %c0_i32 = arith.constant 0 : i32
    %c0_i32_0 = arith.constant 0 : i32
    %c0_i32_1 = arith.constant 0 : i32
    return %c0_i32, %c0_i32_0 : i32, i32
  }
  func.func @transform_9(%arg0: i32, %arg1: i32) -> (i32, i32, i32) {
    %c0_i32 = arith.constant 0 : i32
    %c0_i32_0 = arith.constant 0 : i32
    return %arg0, %arg1, %c0_i32 : i32, i32, i32
  }
}

</mosaic_0001>

<bundles_post_ra>
// kernel: tpu_custom_call.1
= control target key start
LH: loop header
LB: loop body
LE: loop exit
PB: predicated region body
PF: predicated region fallthrough
CT: control target
= control target key end

     0   :  { %s2351_s0 = inlined_call_operand.hbm [shape: bf16[2,16,128], index: 0, kind: input, shape index: {}]   ;;  %s2352_s1 = inlined_call_operand.hbm [shape: bf16[2,16,128], index: 1, kind: input, shape index: {}]   ;;  %s2353_s2 = inlined_call_operand.hbm [shape: bf16[2,16,128], index: 2, kind: input, shape index: {}]   ;;  %s2354_s3 = inlined_call_operand.hbm [shape: f32[3,128], index: 3, kind: input, shape index: {}]   ;;  %s2355_s4 = inlined_call_operand.hbm [shape: bf16[128,128], index: 4, kind: input, shape index: {}]   ;;  %s2356_s5 = inlined_call_operand.hbm [shape: f32[1,128], index: 5, kind: input, shape index: {}]   ;;  %s2357_s6 = inlined_call_operand.hbm [shape: f32[3,128], index: 6, kind: input, shape index: {}]   ;;  %s2358_s7 = inlined_call_operand.hbm [shape: bf16[128,128], index: 7, kind: input, shape index: {}]   ;;  %s2359_s8 = inlined_call_operand.hbm [shape: f32[1,128], index: 8, kind: input, shape index: {}]   ;;  %s2360_s9 = inlined_call_operand.hbm [shape: bf16[2,16,128], index: 9, kind: output, shape index: {}]  }
   0x1   :  { %2390 = sst [smem:[#allocation35_spill]] %s2352_s1 }
   0x2   :  { %2391 = sst [smem:[#allocation36_spill]] %s2354_s3 }
   0x3   :  { %2392 = sst [smem:[#allocation37_spill]] %s2356_s5 }
   0x4   :  { %2393 = sst [smem:[#allocation38_spill]] %s2358_s7 }
   0x5   :  { %2394 = sst [smem:[#allocation39_spill]] %s2360_s9 }
   0x6   :  { %14 = vsyncpa [#allocation4], 0 }
   0x7   :  { %16 = vsyncpa [#allocation4 + $0x1], 0 }
   0x8   :  { %17 = vsyncpa [#allocation7], 0 }
   0x9   :  { %19 = vsyncpa [#allocation7 + $0x1], 0 }
   0xa   :  { %20 = vsyncpa [#allocation10], 0 }
   0xb   :  { %21 = vsyncpa [#allocation13], 0 }
   0xc   :  { %22 = vsyncpa [#allocation16], 0 }
   0xd   :  { %23 = vsyncpa [#allocation5], 0 }
   0xe   :  { %25 = vsyncpa [#allocation5 + $0x1], 0  ;;  %s1906_s30 = smov 0   ;;  %s1908_s10 = smov 0  }
   0xf   :  { %s1910_s11 = smov 0   ;;  %s1912_s12 = smov 0  }
  0x10   :  { %s1914_s13 = smov 0   ;;  %s1916_s14 = smov 0  }
  0x11 LB: > { %2395 = sst [smem:[#allocation25_spill]] %s1817_s30  ;;  %s1937_s15 = sadd.s32 4294967295, %s1837_s14   ;;  %s1837_s14 = sphi %s1916_s14, %s31_s14   ;;  %s1833_s13 = sphi %s1914_s13, %s2446_s13   ;;  %s1829_s12 = sphi %s1912_s12, %s2445_s12   ;;  %s1825_s11 = sphi %s1910_s11, %s2444_s11   ;;  %s1821_s10 = sphi %s1908_s10, %s2448_s10   ;;  %s1817_s30 = sphi %s1906_s30, %s2447_s30  }
  0x12   : > { %2396 = sst [smem:[#allocation26_spill]] %s1825_s11  ;;  %p1196_p0 = scmp.ge.s32.totalorder %s1837_s14, 1 }
  0x13   : > { %2397 = sst [smem:[#allocation27_spill]] %s1829_s12  ;;  %p2361_p1 = scmp.eq.s32.totalorder %s1937_s15, 0 }
  0x14   : > { %2398 = sst [smem:[#allocation28_spill]] %s1833_s13  ;;  %p304_p2 = scmp.lt.s32.totalorder %s1837_s14, 3 }
  0x15   : > { %2399 = sst [smem:[#allocation29_spill]] %s1837_s14  ;;  %s1839_s17 = smov [#allocation9]  }
  0x16   : > { %2400 = sst [smem:[#allocation30_spill]] %s1937_s15  ;;  %p1942_p3 = pnand %p1196_p0, %p304_p2 }
  0x17   : > { %s317_s18 = sshll.u32 %s1839_s17, 4  ;;  %s1840_s19 = smov [#allocation12]   ;;  %s318_s18 = int_to_ptr.vmem [resolvable:$true] %s317_s18 }
  0x18   : > { %s2401_s16 = scalar_select %p1942_p3, 1, 0 }
  0x19   : > { %p1357_p5 = pneg %p1942_p3  ;;  %s341_s20 = sshll.u32 %s1840_s19, 4  ;;  %s1955_s20 = int_to_ptr.vmem [resolvable:$true] %s341_s20 }
  0x1a   : > { %s1841_s22 = smov [#allocation15]   ;;  %s2403_s3 = sld [smem:[#allocation36_spill]] }
  0x1b   : > { %p1951_p6 = pnand %p1357_p5, %p2361_p1  ;;  %s1957_s23 = sshll.u32 %s1841_s22, 4  ;;  %s363_s23 = int_to_ptr.vmem [resolvable:$true] %s1957_s23 }
  0x1d   : > { %s2402_s21 = scalar_select %p1951_p6, 1, 0 }
  0x1e   : > { %p1967_p8 = pneg %p1951_p6 }
  0x20   : > { %s1481_s26 = scalar_lea.hbm %s2403_s3, 64 }
  0x21   : > { %p1482_p7 = scmp.ne.s32.totalorder %s2403_s3, %s1481_s26  ;;  %p1488_p11 = scmp.lt.u32.totalorder %s1481_s26, %s2403_s3 }
  0x22   : > { %s2404_s29 = scalar_select %p1967_p8, 1, 0 }
  0x23   : > { %p1484_p9 = pnand %p1967_p8, %p1482_p7 }
  0x25   : > { %p1485_p10 = pneg %p1484_p9 }
  0x27   : > { %p1490_p12 = pnand %p1488_p11, %p1485_p10 }
  0x29   : > { %1493 = shalt.err (!%p1490_p12)
}
  0x2a   : > { %s1494_s22 = scalar_lea.vmem %s318_s18, 64  ;;  %p1502_p5 = scmp.lt.s32.totalorder %s318_s18, %s318_s18 }
  0x2b   : > { %p1495_p13 = scmp.ne.s32.totalorder %s318_s18, %s1494_s22  ;;  %p1503_p4 = scmp.lt.s32.totalorder %s1494_s22, %s1494_s22 }
  0x2d   : > { %p1497_p0 = pnand %p1495_p13, %p1967_p8  ;;  %p1504_p1 = por %p1503_p4, %p1502_p5 }
  0x2f   : > { %p1498_p2 = pneg %p1497_p0 }
  0x31   : > { %p1505_p3 = pnand %p1504_p1, %p1498_p2 }
  0x33   : > { %1508 = shalt.err (!%p1505_p3)
}
  0x34   : > { %1360 = dma.hbm_to_vmem [thread:$0]  (!%p1951_p6), %s2403_s3, 64, %s318_s18, [#allocation10]  }
  0x35   : > { %s2405_s5 = sld [smem:[#allocation37_spill]] }
  0x3b   : > { %s1509_s28 = scalar_lea.hbm %s2405_s5, 16 }
  0x3c   : > { %p1510_p7 = scmp.ne.s32.totalorder %s2405_s5, %s1509_s28  ;;  %p1516_p1 = scmp.lt.u32.totalorder %s1509_s28, %s2405_s5 }
  0x3e   : > { %p1512_p9 = pnand %p1510_p7, %p1967_p8 }
  0x40   : > { %p1513_p4 = pneg %p1512_p9 }
  0x42   : > { %p1518_p3 = pnand %p1516_p1, %p1513_p4 }
  0x44   : > { %1521 = shalt.err (!%p1518_p3)
}
  0x45   : > { %s1522_s18 = scalar_lea.vmem %s1955_s20, 16  ;;  %s1529_s24 = scalar_lea.vmem %s1955_s20, 32 }
  0x46   : > { %p1523_p10 = scmp.ne.s32.totalorder %s1955_s20, %s1522_s18  ;;  %p1530_p13 = scmp.lt.s32.totalorder %s1955_s20, %s1955_s20 }
  0x47   : > { %p1531_p0 = scmp.lt.s32.totalorder %s1529_s24, %s1522_s18 }
  0x48   : > { %p1525_p11 = pnand %p1523_p10, %p1967_p8 }
  0x49   : > { %p1532_p2 = por %p1531_p0, %p1530_p13 }
  0x4a   : > { %p1526_p12 = pneg %p1525_p11 }
  0x4c   : > { %p1533_p5 = pnand %p1532_p2, %p1526_p12 }
  0x4e   : > { %1536 = shalt.err (!%p1533_p5)
}
  0x4f   : > { %1366 = dma.hbm_to_vmem [thread:$0]  (!%p1951_p6), %s2405_s5, 16, %s1955_s20, [#allocation13]  }
  0x50   : > { %s2406_s7 = sld [smem:[#allocation38_spill]] }
  0x56   : > { %s1537_s28 = scalar_lea.hbm %s2406_s7, 1024 }
  0x57   : > { %p1538_p7 = scmp.ne.s32.totalorder %s2406_s7, %s1537_s28  ;;  %p1544_p1 = scmp.lt.u32.totalorder %s1537_s28, %s2406_s7 }
  0x59   : > { %p1540_p9 = pnand %p1538_p7, %p1967_p8 }
  0x5b   : > { %p1541_p4 = pneg %p1540_p9 }
  0x5d   : > { %p1546_p3 = pnand %p1544_p1, %p1541_p4 }
  0x5f   : > { %1549 = shalt.err (!%p1546_p3)
}
  0x60   : > { %s1550_s24 = scalar_lea.vmem %s363_s23, 1024  ;;  %p1558_p13 = scmp.lt.s32.totalorder %s363_s23, %s363_s23 }
  0x61   : > { %p1551_p10 = scmp.ne.s32.totalorder %s363_s23, %s1550_s24  ;;  %p1559_p0 = scmp.lt.s32.totalorder %s1550_s24, %s1550_s24 }
  0x63   : > { %p1553_p11 = pnand %p1551_p10, %p1967_p8  ;;  %p1560_p2 = por %p1559_p0, %p1558_p13 }
  0x65   : > { %p1554_p12 = pneg %p1553_p11 }
  0x67   : > { %p1561_p5 = pnand %p1560_p2, %p1554_p12 }
  0x69   : > { %1564 = shalt.err (!%p1561_p5)
}
  0x6a   : > { %s2364_s20 = smov 64   ;;  %s2366_s9 = smov 4  }
  0x6b   : > { %1372 = dma.hbm_to_vmem [thread:$0]  (!%p1951_p6), %s2406_s7, 1024, %s363_s23, [#allocation16], %s2364_s20, %s2364_s20, %s2366_s9  }
  0x6c   : > { %s1195_s27 = sadd.s32 4294967294, %s1837_s14   ;;  %s43_s28 = sadd.s32 1, %s1833_s13 }
  0x6d   : > { %s52_s17 = sadd.s32 1, %s1825_s11  ;;  %p45_p7 = scmp.ge.s32.totalorder %s43_s28, 2 }
  0x6e   : > { %p59_p9 = scmp.ne.s32.totalorder %s1825_s11, %s1821_s10  ;;  %p60_p4 = scmp.eq.s32.totalorder %s1837_s14, 0 }
  0x6f   : > { %p65_p1 = scmp.ne.s32.totalorder %s1821_s10, %s1817_s30  ;;  %s2450_s28 = smov (%p45_p7, %s43_s28), 0 }
  0x70   : > { %2407 = sst [smem:[#allocation31_spill]] %s2450_s28  ;;  %p61_p3 = por %p60_p4, %p59_p9 }
  0x71   : > { %p2408_p10 = scmp.eq.s32.totalorder %s1937_s15, 0  ;;  %s47_s23 = ssub.s32 %s1833_s13, %s2450_s28 }
  0x72   : > { %p291_p12 = scmp.eq.s32.totalorder %s1937_s15, 1  ;;  %p50_p13 = scmp.eq.s32.totalorder %s47_s23, 0 }
  0x73   : > { %p2041_p11 = por %p2408_p10, %p65_p1  ;;  %p297_p0 = scmp.eq.s32.totalorder %s1195_s27, 1 }
  0x74   : > { %p2048_p2 = por %p291_p12, %p59_p9  ;;  %p1396_p5 = scmp.lt.s32.totalorder %s1837_s14, 2 }
  0x75   : > { %s2409_s19 = scalar_select %p2041_p11, 1, 0 }
  0x76   : > { %s2410_s22 = scalar_select %p2048_p2, 1, 0 }
  0x77   : > { %s2054_s18 = scalar_select %p50_p13, %s1825_s11, %s52_s17  }
  0x78   : > { %2411 = sst [smem:[#allocation32_spill]] %s2410_s22  ;;  %p2056_p7 = por %p297_p0, %p65_p1 }
  0x79   : > { %2412 = sst [smem:[#allocation33_spill]] %s2054_s18  ;;  %s2061_s25 = sand.u32 1, %s1825_s11  }
  0x7a   : > { %s2413_s24 = scalar_select %p2056_p7, 1, 0 }
  0x7b   : > { %s2064_s26 = sshll.u32 %s1833_s13, 7  ;;  %p2066_p4 = pnand %p1396_p5, %p61_p3 }
  0x7c   : > { %2414 = sst [smem:[#allocation34_spill]] %s2413_s24  ;;  %s2074_s17 = scalar_lea.hbm %s2351_s0, %s2064_s26 }
  0x7d   : > { %s2415_s27 = scalar_select %p2066_p4, 1, 0 }
  0x7e   : > { %s410_s9 = sand.u32 1, %s1837_s14   ;;  %s2373_s3 = sshll.u32 %s2061_s25, 2 }
  0x7f   : > { %s2416_s1 = sld [smem:[#allocation35_spill]]  ;;  %s414_s13 = scalar_lea.vmem [#allocation6], %s2373_s3 }
  0x80   : > { %s427_s18 = sshll.u32 %s414_s13, 4  ;;  %s1844_s20 = smov [#allocation11]   ;;  %s2086_s18 = int_to_ptr.vmem [resolvable:$true] %s427_s18 }
  0x81   : > { %s2088_s23 = sshll.u32 %s1844_s20, 4  ;;  %s2090_s11 = scalar_lea.sflag [#allocation7], %s410_s9  ;;  %s328_s23 = int_to_ptr.vmem [resolvable:$true] %s2088_s23 }
  0x82   : > { %p2096_p1 = pneg %p2066_p4 }
  0x84   : > { %s2417_s5 = scalar_select %p2096_p1, 1, 0 }
  0x85   : > { %s2082_s28 = scalar_lea.hbm %s2416_s1, %s2064_s26  ;;  %s1570_s3 = scalar_lea.hbm %s2416_s1, 256 }
  0x86   : > { %s1565_s14 = scalar_lea.hbm %s2082_s28, 64  ;;  %p1571_p12 = scmp.lt.u32.totalorder %s2082_s28, %s2416_s1 }
  0x87   : > { %p1566_p9 = scmp.ne.s32.totalorder %s2082_s28, %s1565_s14  ;;  %p1572_p13 = scmp.lt.u32.totalorder %s1570_s3, %s1565_s14 }
  0x88   : > { %p1574_p5 = scmp.lt.u32.totalorder %s1565_s14, %s2082_s28 }
  0x89   : > { %p1568_p3 = pnand %p2096_p1, %p1566_p9  ;;  %p1573_p0 = por %p1572_p13, %p1571_p12 }
  0x8b   : > { %p1569_p10 = pneg %p1568_p3  ;;  %p1575_p7 = por %p1574_p5, %p1573_p0 }
  0x8d   : > { %p1576_p2 = pnand %p1575_p7, %p1569_p10 }
  0x8f   : > { %1579 = shalt.err (!%p1576_p2)
}
  0x90   : > { %s1580_s9 = scalar_lea.vmem %s2086_s18, 64  ;;  %s1845_s7 = smov [#allocation6]  }
  0x91   : > { %p1581_p9 = scmp.ne.s32.totalorder %s2086_s18, %s1580_s9  ;;  %s1585_s13 = sshll.u32 %s1845_s7, 4  ;;  %s1586_s13 = int_to_ptr.vmem [resolvable:$false] %s1585_s13 }
  0x92   : > { %s1587_s24 = scalar_lea.vmem %s1586_s13, 128  ;;  %p1588_p6 = scmp.lt.s32.totalorder %s2086_s18, %s1586_s13 }
  0x93   : > { %p1583_p3 = pnand %p1581_p9, %p2096_p1  ;;  %p1589_p8 = scmp.lt.s32.totalorder %s1587_s24, %s1580_s9 }
  0x95   : > { %p1584_p11 = pneg %p1583_p3  ;;  %p1590_p12 = por %p1589_p8, %p1588_p6 }
  0x97   : > { %p1591_p13 = pnand %p1590_p12, %p1584_p11 }
  0x99   : > { %1594 = shalt.err (!%p1591_p13)
}
  0x9a   : > { %1382 = dma.hbm_to_vmem [thread:$0]  (!%p2066_p4), %s2082_s28, 64, %s2086_s18, %s2090_s11  }
  0x9b   : > { %s1595_s20 = scalar_lea.hbm %s2355_s4, 1024  ;;  %p2418_p6 = scmp.ne.s32.totalorder %s2404_s29, 0 }
  0x9c   : > { %p1596_p2 = scmp.ne.s32.totalorder %s2355_s4, %s1595_s20  ;;  %p1602_p7 = scmp.lt.u32.totalorder %s1595_s20, %s2355_s4 }
  0x9e   : > { %p1598_p8 = pnand %p1596_p2, %p2418_p6 }
  0xa0   : > { %p1599_p11 = pneg %p1598_p8 }
  0xa2   : > { %p1604_p10 = pnand %p1602_p7, %p1599_p11 }
  0xa4   : > { %1607 = shalt.err (!%p1604_p10)
}
  0xa5   : > { %s1608_s24 = scalar_lea.vmem %s328_s23, 1024  ;;  %p1616_p3 = scmp.lt.s32.totalorder %s328_s23, %s328_s23 }
  0xa6   : > { %p1609_p0 = scmp.ne.s32.totalorder %s328_s23, %s1608_s24  ;;  %p1617_p12 = scmp.lt.s32.totalorder %s1608_s24, %s1608_s24 }
  0xa8   : > { %p1611_p5 = pnand %p1609_p0, %p2418_p6  ;;  %p1618_p13 = por %p1617_p12, %p1616_p3 }
  0xaa   : > { %p1612_p9 = pneg %p1611_p5 }
  0xac   : > { %p1619_p4 = pnand %p1618_p13, %p1612_p9 }
  0xae   : > { %1622 = shalt.err (!%p1619_p4)
}
  0xaf   : > { %p2419_p2 = scmp.ne.s32.totalorder %s2402_s21, 0  ;;  %s2420_s1 = smov 4  }
  0xb0   : > { %s2421_s28 = smov 64   ;;  %s1846_s14 = smov [#allocation14]  }
  0xb1   : > { %1363 = dma.hbm_to_vmem [thread:$0]  (!%p2419_p2), %s2355_s4, 1024, %s328_s23, [#allocation10], %s2421_s28, %s2421_s28, %s2420_s1  }
  0xb2   : > { %s352_s20 = sshll.u32 %s1846_s14, 4  ;;  %s1847_s7 = smov [#allocation17]   ;;  %s353_s20 = int_to_ptr.vmem [resolvable:$true] %s352_s20 }
  0xb3   : > { %s376_s9 = sshll.u32 %s1847_s7, 4  ;;  %s1623_s30 = scalar_lea.hbm %s2357_s6, 64  ;;  %s377_s9 = int_to_ptr.vmem [resolvable:$true] %s376_s9 }
  0xb4   : > { %p1624_p4 = scmp.ne.s32.totalorder %s2357_s6, %s1623_s30  ;;  %p1630_p7 = scmp.lt.u32.totalorder %s1623_s30, %s2357_s6 }
  0xb6   : > { %p1626_p8 = pnand %p1624_p4, %p2418_p6 }
  0xb8   : > { %p1627_p11 = pneg %p1626_p8 }
  0xba   : > { %p1632_p10 = pnand %p1630_p7, %p1627_p11 }
  0xbc   : > { %1635 = shalt.err (!%p1632_p10)
}
  0xbd   : > { %s1636_s23 = scalar_lea.vmem %s353_s20, 64  ;;  %p1644_p3 = scmp.lt.s32.totalorder %s353_s20, %s353_s20 }
  0xbe   : > { %p1637_p0 = scmp.ne.s32.totalorder %s353_s20, %s1636_s23  ;;  %p1645_p12 = scmp.lt.s32.totalorder %s1636_s23, %s1636_s23 }
  0xc0   : > { %p1639_p5 = pnand %p1637_p0, %p2418_p6  ;;  %p1646_p13 = por %p1645_p12, %p1644_p3 }
  0xc2   : > { %p1640_p9 = pneg %p1639_p5 }
  0xc4   : > { %p1647_p1 = pnand %p1646_p13, %p1640_p9 }
  0xc6   : > { %1650 = shalt.err (!%p1647_p1)
}
  0xc7   : > { %1369 = dma.hbm_to_vmem [thread:$0]  (!%p2419_p2), %s2357_s6, 64, %s353_s20, [#allocation13]  }
  0xc8   : > { %s1651_s3 = scalar_lea.hbm %s2359_s8, 16 }
  0xc9   : > { %p1652_p4 = scmp.ne.s32.totalorder %s2359_s8, %s1651_s3  ;;  %p1658_p1 = scmp.lt.u32.totalorder %s1651_s3, %s2359_s8 }
  0xcb   : > { %p1654_p8 = pnand %p1652_p4, %p2418_p6 }
  0xcd   : > { %p1655_p11 = pneg %p1654_p8 }
  0xcf   : > { %p1660_p7 = pnand %p1658_p1, %p1655_p11 }
  0xd1   : > { %1663 = shalt.err (!%p1660_p7)
}
  0xd2   : > { %s1664_s18 = scalar_lea.vmem %s377_s9, 16  ;;  %s1671_s20 = scalar_lea.vmem %s377_s9, 32 }
  0xd3   : > { %p1665_p10 = scmp.ne.s32.totalorder %s377_s9, %s1664_s18  ;;  %p1672_p9 = scmp.lt.s32.totalorder %s377_s9, %s377_s9 }
  0xd4   : > { %p1673_p3 = scmp.lt.s32.totalorder %s1671_s20, %s1664_s18 }
  0xd5   : > { %p1667_p0 = pnand %p1665_p10, %p2418_p6 }
  0xd6   : > { %p1674_p12 = por %p1673_p3, %p1672_p9 }
  0xd7   : > { %p1668_p5 = pneg %p1667_p0 }
  0xd9   : > { %p1675_p13 = pnand %p1674_p12, %p1668_p5 }
  0xdb   : > { %1678 = shalt.err (!%p1675_p13)
}
  0xdc   : > { %1375 = dma.hbm_to_vmem [thread:$0]  (!%p2419_p2), %s2359_s8, 16, %s377_s9, [#allocation16]  }
  0xdd   : > { %s1204_s29 = sshll.u32 %s2061_s25, 3  ;;  %s1252_s22 = sadd.s32 64, %s2064_s26 }
  0xde   : > { %s2183_s3 = scalar_lea.hbm %s2353_s2, %s1252_s22  ;;  %s391_s21 = scalar_lea.vmem [#allocation3], %s1204_s29 }
  0xdf   : > { %s400_s14 = sshll.u32 %s391_s21, 4  ;;  %s2422_s7 = sshll.u32 %s2061_s25, 2  ;;  %s2187_s14 = int_to_ptr.vmem [resolvable:$true] %s400_s14 }
  0xe0   : > { %s438_s13 = scalar_lea.vmem [#allocation8], %s2422_s7  ;;  %s388_s18 = scalar_lea.sflag [#allocation4], %s2061_s25 }
  0xe1   : > { %s452_s24 = sshll.u32 %s438_s13, 4  ;;  %s1679_s9 = scalar_lea.hbm %s2074_s17, 128  ;;  %s2189_s24 = int_to_ptr.vmem [resolvable:$true] %s452_s24 }
  0xe2   : > { %p1680_p6 = scmp.ne.s32.totalorder %s2074_s17, %s1679_s9  ;;  %p2423_p2 = scmp.ne.s32.totalorder %s2417_s5, 0 }
  0xe3   : > { %s1684_s23 = scalar_lea.hbm %s2351_s0, 256  ;;  %p1685_p11 = scmp.lt.u32.totalorder %s2074_s17, %s2351_s0 }
  0xe4   : > { %p1682_p4 = pnand %p1680_p6, %p2423_p2  ;;  %p1686_p1 = scmp.lt.u32.totalorder %s1684_s23, %s1679_s9 }
  0xe5   : > { %p1688_p10 = scmp.lt.u32.totalorder %s1679_s9, %s2074_s17 }
  0xe6   : > { %p1683_p8 = pneg %p1682_p4  ;;  %p1687_p7 = por %p1686_p1, %p1685_p11 }
  0xe8   : > { %p1689_p0 = por %p1688_p10, %p1687_p7 }
  0xea   : > { %p1690_p5 = pnand %p1689_p0, %p1683_p8 }
  0xec   : > { %1693 = shalt.err (!%p1690_p5)
}
  0xed   : > { %s1694_s22 = scalar_lea.vmem %s2187_s14, 128  ;;  %s1848_s30 = smov [#allocation3]  }
  0xee   : > { %p1695_p9 = scmp.ne.s32.totalorder %s2187_s14, %s1694_s22  ;;  %s1699_s15 = sshll.u32 %s1848_s30, 4  ;;  %s1700_s15 = int_to_ptr.vmem [resolvable:$false] %s1699_s15 }
  0xef   : > { %s1701_s21 = scalar_lea.vmem %s1700_s15, 256  ;;  %p1702_p13 = scmp.lt.s32.totalorder %s2187_s14, %s1700_s15 }
  0xf0   : > { %p1697_p3 = pnand %p1695_p9, %p2423_p2  ;;  %p1703_p6 = scmp.lt.s32.totalorder %s1701_s21, %s1694_s22 }
  0xf2   : > { %p1698_p12 = pneg %p1697_p3  ;;  %p1704_p4 = por %p1703_p6, %p1702_p13 }
  0xf4   : > { %p1705_p11 = pnand %p1704_p4, %p1698_p12 }
  0xf6   : > { %1708 = shalt.err (!%p1705_p11)
}
  0xf7   : > { %p2424_p8 = scmp.ne.s32.totalorder %s2415_s27, 0  ;;  %s1709_s7 = scalar_lea.hbm %s2183_s3, 64 }
  0xf8   : > { %p1710_p1 = scmp.ne.s32.totalorder %s2183_s3, %s1709_s7  ;;  %s1714_s26 = scalar_lea.hbm %s2353_s2, 256 }
  0xf9   : > { %1379 = dma.hbm_to_vmem [thread:$0]  (!%p2424_p8), %s2074_s17, 128, %s2187_s14, %s388_s18, %s2421_s28, %s2421_s28, %s2420_s1  }
  0xfa   : > { %p1712_p7 = pnand %p1710_p1, %p2423_p2  ;;  %p1715_p0 = scmp.lt.u32.totalorder %s2183_s3, %s2353_s2 }
  0xfb   : > { %p1716_p5 = scmp.lt.u32.totalorder %s1714_s26, %s1709_s7  ;;  %p1718_p3 = scmp.lt.u32.totalorder %s1709_s7, %s2183_s3 }
  0xfc   : > { %p1713_p10 = pneg %p1712_p7 }
  0xfd   : > { %p1717_p9 = por %p1716_p5, %p1715_p0 }
  0xff   : > { %p1719_p12 = por %p1718_p3, %p1717_p9 }
 0x101   : > { %p1720_p13 = pnand %p1719_p12, %p1713_p10 }
 0x103   : > { %1723 = shalt.err (!%p1720_p13)
}
 0x104   : > { %s1724_s25 = scalar_lea.vmem %s2189_s24, 64  ;;  %s1849_s17 = smov [#allocation8]  }
 0x105   : > { %p1725_p6 = scmp.ne.s32.totalorder %s2189_s24, %s1724_s25  ;;  %s1729_s1 = sshll.u32 %s1849_s17, 4  ;;  %s1730_s1 = int_to_ptr.vmem [resolvable:$false] %s1729_s1 }
 0x106   : > { %s1731_s28 = scalar_lea.vmem %s1730_s1, 128  ;;  %p1732_p1 = scmp.lt.s32.totalorder %s2189_s24, %s1730_s1 }
 0x107   : > { %p1727_p4 = pnand %p1725_p6, %p2423_p2  ;;  %p1733_p7 = scmp.lt.s32.totalorder %s1731_s28, %s1724_s25 }
 0x109   : > { %p1728_p11 = pneg %p1727_p4  ;;  %p1734_p0 = por %p1733_p7, %p1732_p1 }
 0x10b   : > { %p1735_p5 = pnand %p1734_p0, %p1728_p11 }
 0x10d   : > { %1738 = shalt.err (!%p1735_p5)
}
 0x10e   : > { %1385 = dma.hbm_to_vmem [thread:$0]  (!%p2424_p8), %s2183_s3, 64, %s2189_s24, %s2090_s11  }
 0x10f   : > { %p2425_p10 = scmp.ne.s32.totalorder %s2401_s16, 0 }
 0x110   : > { %s2243_s5 = sand.u32 (!%p2425_p10), 1, %s1821_s10   ;;  %p2426_p2 = scmp.ne.s32.totalorder (!%p2425_p10), %s2409_s19, 0 }
 0x111   : > { %461 = sbr.rel (%p2425_p10) target bundleno = 817 (0x331), region = 56  ;;  %s1214_s14 = sshll.u32 (!%p2425_p10), %s2243_s5, 3 }
 0x112   : > { %s464_s18 = scalar_lea.sflag (!%p2425_p10), [#allocation4], %s2243_s5  ;;  %s467_s12 = scalar_lea.vmem (!%p2425_p10), [#allocation3], %s1214_s14 }
 0x118   : > { %1792 = dma.done.wait (%p2426_p2), %s464_s18, 128  }
 0x119   : > { %1794 = vsyncadd (%p2426_p2), %s464_s18, 4294967168  ;;  %s2427_s11 = sld [smem:[#allocation30_spill]]  ;;  %s1215_s27 = sshll.u32 %s2243_s5, 2 }
 0x11a   : > { %s476_s24 = scalar_lea.vmem [#allocation6], %s1215_s27 }
 0x11f   : > { %s472_s16 = sand.u32 1, %s2427_s11  }
 0x120   : > { %s473_s3 = scalar_lea.sflag [#allocation7], %s472_s16 }
 0x121   : > { %1796 = dma.done.wait (%p2426_p2), %s473_s3, 128  }
 0x122   : > { %1798 = vsyncadd (%p2426_p2), %s473_s3, 4294967168  ;;  %s485_s29 = scalar_lea.vmem [#allocation8], %s1215_s27  ;;  %p2428_p8 = scmp.eq.s32.totalorder %s2427_s11, 0 }
 0x124   : > { %1800 = dma.done.wait (%p2428_p8), [#allocation10], 1088   ;;  %p2429_p9 = pmov %p2428_p8 }
 0x125   : > { %p2430_p3 = pmov %p2428_p8 }
 0x126   : > { %1802 = vsyncadd (%p2429_p9), [#allocation10], 4294966208 }
 0x127   : > { %1804 = dma.done.wait (%p2430_p3), [#allocation13], 80   ;;  %p2431_p12 = pmov %p2430_p3 }
 0x128   : > { %p2432_p13 = pmov %p2430_p3 }
 0x129   : > { %1806 = vsyncadd (%p2431_p12), [#allocation13], 4294967216 }
 0x12a   : > { %1808 = dma.done.wait (%p2432_p13), [#allocation16], 1040   ;;  %p2433_p6 = pmov %p2430_p3 }
 0x12b   : > { %v599_v0 = vlaneseq  ;;  %v1465_v1 = vld [vmem:[#allocation11] sm:$0xff]   ;;  %v1466_v2 = vld [vmem:[#allocation11 + $0x8] sm:$0xff]   ;;  %v1467_v4 = vld [vmem:[#allocation11 + $0x10] sm:$0xff]   ;;  %vm586_vm0 = vcmask 1041408   ;;  %vm616_vm1 = vcmask 1046528   ;;  %vm638_vm2 = vcmask 1045504  }
 0x12c   : > { %1810 = vsyncadd (%p2433_p6), [#allocation16], 4294966256  ;;  %1285 = vmatprep.subr.bf16.mxu0 %v1465_v1  ;;  %v1468_v7 = vld [vmem:[#allocation11 + $0x18] sm:$0xff]   ;;  %v574_v9 = vld [vmem:[%s476_s24] sm:$0x8]  ;;  %v1850_v61 = vmov 0.0  }
 0x12d   : > { %v2271_v3 = vshrl.u32 %v599_v0, 7  ;;  %1286 = vmatpush3.bf16.msra.mxu0 %v1465_v1  ;;  %v1257_v8 = vld [vmem:[%s467_s12] sm:$0xff]   ;;  %v578_v10 = vld [vmem:[%s485_s29] sm:$0x1]  ;;  %v575_v14 = vunpack.c.l.bf16 %v574_v9  ;;  %1305 = vmatprep.subr.bf16.mxu1 %v1850_v61  ;;  %vm1851_vm3 = vmmov 0   ;;  %s2434_s19 = sld [smem:[#allocation27_spill]] }
 0x12e   : > { %1287 = vmatprep.subr.bf16.mxu0 %v1466_v2  ;;  %v1258_v12 = vunpack.c.l.bf16 %v1257_v8  ;;  %v1259_v13 = vunpack.c.h.bf16 %v1257_v8  ;;  %v579_v15 = vunpack.c.l.bf16 %v578_v10  ;;  %v598_v16 = vld [vmem:[#allocation9] sm:$0x7]  ;;  %v1469_v17 = vld [vmem:[#allocation11 + $0x20] sm:$0xff]   ;;  %v1470_v32 = vld [vmem:[#allocation11 + $0x28] sm:$0xff]   ;;  %1321 = vmatprep.mubr.msk.bf16.mxu1 %vm1851_vm3, %v1850_v61  ;;  %s553_s22 = scalar_lea.vmem [#allocation18], %s1214_s14  ;;  %s2435_s30 = sld [smem:[#allocation32_spill]] }
 0x12f   : > { %v608_v5 = vsub.s32 1, %v2271_v3  ;;  %v630_v6 = vsub.s32 2, %v2271_v3  ;;  %v601_v11 = vsub.s32 0, %v2271_v3  ;;  %v577_v20 = vmul.f32 0.0, %v575_v14  ;;  %v1471_v46 = vld [vmem:[#allocation11 + $0x30] sm:$0xff]   ;;  %v1472_v56 = vld [vmem:[#allocation11 + $0x38] sm:$0xff]  }
 0x130   : > { %v580_v21 = vmul.f32 0.0, %v579_v15  ;;  %v587_v22 = vrot.slane %v1258_v12, 6  ;;  %v588_v23 = vrot.slane %v1259_v13, 6  ;;  %v1473_v60 = vld [vmem:[#allocation15] sm:$0xff]   ;;  %v1474_v62 = vld [vmem:[#allocation15 + $0x8] sm:$0xff]   ;;  %v1475_v63 = vld [vmem:[#allocation15 + $0x10] sm:$0xff]  }
 0x131   : > { %1288 = vmatpush3.bf16.msra.mxu0 %v1466_v2  ;;  %v609_v18 = vrot.slane %v598_v16, %v608_v5  ;;  %v631_v19 = vrot.slane %v598_v16, %v630_v6  ;;  %v602_v24 = vrot.slane %v598_v16, %v601_v11  ;;  %v582_v25 = vrot.slane %v577_v20, 6  ;;  %1306 = vmatpush3.bf16.msra.mxu1 %v1473_v60  ;;  %v1476_v0 = vld [vmem:[#allocation15 + $0x18] sm:$0xff]   ;;  %v1477_v1 = vld [vmem:[#allocation15 + $0x20] sm:$0xff]   ;;  %v1478_v2 = vld [vmem:[#allocation15 + $0x28] sm:$0xff]   ;;  %s1003_s21 = sshll.u32 %s553_s22, 4  ;;  %s2436_s9 = sld [smem:[#allocation39_spill]]  ;;  %s2302_s21 = int_to_ptr.vmem [resolvable:$true] %s1003_s21 }
 0x132   : > { %1289 = vmatprep.subr.bf16.mxu0 %v1467_v4  ;;  %v589_v26 = vsel %vm586_vm0, %v587_v22, %v588_v23  ;;  %v594_v27 = vrot.slane %v580_v21, 6  ;;  %1307 = vmatprep.subr.bf16.mxu1 %v1850_v61  ;;  %v1224_v8 = vld [vmem:[#allocation12] ss:$0 sm:$0xff]  ;;  %v786_v13 = vadd.s32 16, %v2271_v3  ;;  %vm1852_vm5 = vmmov 1   ;;  %s988_s20 = scalar_lea.sflag [#allocation5], %s2243_s5 }
 0x133   : > { %v611_v28 = vmul.f32 %v609_v18, %v589_v26  ;;  %v633_v29 = vmul.f32 %v631_v19, %v589_v26  ;;  %v596_v30 = vsel %vm586_vm0, %v582_v25, %v587_v22  ;;  %v604_v33 = vmul.f32 %v602_v24, %v589_v26  ;;  %s1255_s15 = sshll.u32 %s2434_s19, 7  ;;  %vm981_vm6 = vmpackc.low %vm1852_vm5, %vm1852_vm5  ;;  %s1739_s23 = scalar_lea.vmem %s2302_s21, 128 }
 0x134   : > { %v597_v31 = vsel %vm586_vm0, %v588_v23, %v594_v27  ;;  %v610_v34 = vmul.f32 %v609_v18, %v596_v30  ;;  %v603_v37 = vmul.f32 %v602_v24, %v596_v30  ;;  %v632_v38 = vmul.f32 %v631_v19, %v596_v30  ;;  %p1740_p4 = scmp.ne.s32.totalorder %s2302_s21, %s1739_s23  ;;  %p2437_p11 = scmp.ne.s32.totalorder %s2435_s30, 0 }
 0x135   : > { %1290 = vmatpush3.bf16.msra.mxu0 %v1467_v4  ;;  %v612_v35 = vmul.f32 %v609_v18, %v597_v31  ;;  %v618_v36 = vrot.slane %v611_v28, 1  ;;  %v634_v39 = vmul.f32 %v631_v19, %v597_v31  ;;  %v640_v40 = vrot.slane %v633_v29, 2  ;;  %1308 = vmatpush3.bf16.msra.mxu1 %v1474_v62  ;;  %v1479_v4 = vld [vmem:[#allocation15 + $0x30] sm:$0xff]   ;;  %s1853_s25 = smov [#allocation18]  }
 0x136   : > { %1291 = vmatprep.subr.bf16.mxu0 %v1468_v7  ;;  %v617_v41 = vrot.slane %v610_v34, 1  ;;  %v605_v43 = vmul.f32 %v602_v24, %v597_v31  ;;  %v639_v44 = vrot.slane %v632_v38, 2  ;;  %1309 = vmatprep.subr.bf16.mxu1 %v1850_v61  ;;  %v790_v20 = vadd.s32 4294967295, %v786_v13  ;;  %v809_v24 = vld [vmem:[#allocation14] sm:$0x7]  ;;  %p1741_p1 = pnand %p1740_p4, %p2437_p11  ;;  %s1743_s17 = sshll.u32 %s1853_s25, 4  ;;  %s1744_s17 = int_to_ptr.vmem [resolvable:$false] %s1743_s17 }
 0x137   : > { %v620_v42 = vrot.slane %v612_v35, 1  ;;  %v642_v45 = vrot.slane %v634_v39, 2  ;;  %v823_v25 = vrot.slane %v809_v24, %v608_v5  ;;  %v815_v28 = vrot.slane %v809_v24, %v601_v11  ;;  %v1233_v11 = vld [vmem:[#allocation17] ss:$0 sm:$0xff]  ;;  %s2300_s26 = scalar_lea.hbm %s2436_s9, %s1255_s15  ;;  %s1745_s1 = scalar_lea.vmem %s1744_s17, 256 }
 0x138   : > { %v619_v47 = vsel %vm616_vm1, %v617_v41, %v618_v36  ;;  %v641_v51 = vsel %vm638_vm2, %v639_v44, %v640_v40  ;;  %vm796_vm4 = vcmp.lt.s32.totalorder %v790_v20, 16  ;;  %v833_v31 = vrot.slane %v809_v24, %v630_v6  ;;  %p1742_p7 = pneg %p1741_p1  ;;  %p1746_p0 = scmp.lt.s32.totalorder %s2302_s21, %s1744_s17 }
 0x139   : > { %1292 = vmatpush3.bf16.msra.mxu0 %v1468_v7  ;;  %v621_v48 = vsel %vm616_vm1, %v618_v36, %v620_v42  ;;  %v625_v49 = vadd.f32 %v619_v47, %v603_v37  ;;  %v643_v52 = vsel %vm638_vm2, %v640_v40, %v642_v45  ;;  %v627_v53 = vadd.f32 %v620_v42, %v605_v43  ;;  %v1480_v7 = vld [vmem:[#allocation15 + $0x38] sm:$0xff]   ;;  %p1747_p5 = scmp.lt.s32.totalorder %s1745_s1, %s1739_s23 }
 0x13a   : > { %1293 = vmatprep.subr.bf16.mxu0 %v1469_v17  ;;  %v626_v50 = vadd.f32 %v621_v48, %v604_v33  ;;  %1310 = vmatpush3.bf16.msra.mxu1 %v1475_v63 }
 0x13b   : > { %v647_v54 = vadd.f32 %v641_v51, %v625_v49  ;;  %v649_v58 = vadd.f32 %v642_v45, %v627_v53  ;;  %1311 = vmatprep.subr.bf16.mxu1 %v1850_v61  ;;  %p1748_p10 = por %p1747_p5, %p1746_p0 }
 0x13c   : > { %v648_v55 = vadd.f32 %v643_v52, %v626_v50 }
 0x13d   : > { %1294 = vmatpush3.bf16.msra.mxu0 %v1469_v17  ;;  %v651_v59 = vpack.c.bf16 %v649_v58, %v649_v58  ;;  %p1749_p2 = pnand %p1748_p10, %p1742_p7 }
 0x13e   : > { %1295 = vmatprep.subr.bf16.mxu0 %v1470_v32  ;;  %v650_v57 = vpack.c.bf16 %v648_v55, %v647_v54  ;;  %1312 = vmatpush3.bf16.msra.mxu1 %v1476_v0 }
 0x13f   : > { %1313 = vmatprep.subr.bf16.mxu1 %v1850_v61 }
 0x140   : > { %1301 = vmatprep.mubr.bf16.mxu0 %v650_v57 }
 0x141   : > { %1296 = vmatpush3.bf16.msra.mxu0 %v1470_v32 }
 0x142   : > { %1297 = vmatprep.subr.bf16.mxu0 %v1471_v46  ;;  %1314 = vmatpush3.bf16.msra.mxu1 %v1477_v1 }
 0x143   : > { %1315 = vmatprep.subr.bf16.mxu1 %v1850_v61 }
 0x145   : > { %1298 = vmatpush3.bf16.msra.mxu0 %v1471_v46 }
 0x146   : > { %1299 = vmatprep.subr.bf16.mxu0 %v1472_v56  ;;  %1316 = vmatpush3.bf16.msra.mxu1 %v1478_v2 }
 0x147   : > { %1317 = vmatprep.subr.bf16.mxu1 %v1850_v61 }
 0x149   : > { %1300 = vmatpush3.bf16.msra.mxu0 %v1472_v56 }
 0x14a   : > { %1318 = vmatpush3.bf16.msra.mxu1 %v1479_v4 }
 0x14b   : > { %1319 = vmatprep.subr.bf16.mxu1 %v1850_v61 }
 0x14c   : > { %1302 = vmatmul.mubr.bf16.vlgmr.msra.gmra.mrb[0].mxu0 %v651_v59 }
 0x14e   : > { %1320 = vmatpush3.bf16.msra.mxu1 %v1480_v7 }
 0x21f   : > { %v1303_v9 = vpop.f32.mrb[0].mxu0 }
 0x220   : > { %v766_v10 = vadd.f32 %v1303_v9, %v1224_v8  ;;  %v757_v12 = vpop.f32.mrb[1].mxu0 }
 0x221   : > { %v758_v14 = vadd.f32 %v1224_v8, %v757_v12  ;;  %v1304_v15 = vpop.f32.mrb[2].mxu0 }
 0x222   : > { %v773_v16 = vmax.f32 %v766_v10, 0.0  ;;  %v760_v17 = vpop.f32.mrb[3].mxu0 }
 0x223   : > { %v771_v18 = vmax.f32 %v758_v14, 0.0  ;;  %v761_v19 = vadd.f32 %v1224_v8, %v760_v17 }
 0x224   : > { %776 = vst [vmem:[#allocation2 + $0x10] sm:$0x3] %v773_v16 }
 0x225   : > { %774 = vst [vmem:[#allocation2] sm:$0xff] %v771_v18  ;;  %v772_v21 = vmax.f32 %v761_v19, 0.0 }
 0x226   : > { %780 = vst [vmem:[#allocation2] sm:$0x1] %v1850_v61 }
 0x227   : > { %807 = vst [vmem:[#allocation2 + $0x8] sm:$0xff] %v772_v21  ;;  %v817_v35 = vmul.f32 %v815_v28, %v772_v21 }
 0x22b   : > { %v793_v22 = vld [vmem:[#allocation2 + $0x10] sm:$0x3] }
 0x22c   : > { %v805_v23 = vsel %vm796_vm4, %v793_v22, 0.0 }
 0x22d   : > { %808 = vst [vmem:[#allocation2 + $0x10] sm:$0x3] %v805_v23  ;;  %v791_v26 = vld [vmem:[#allocation2] sm:$0xff] }
 0x22e   : > { %v818_v27 = vld [vmem:[#allocation2 + $0x1] sm:$0xff]  ;;  %v816_v29 = vmul.f32 %v815_v28, %v791_v26 }
 0x22f   : > { %v824_v30 = vmul.f32 %v823_v25, %v818_v27  ;;  %v828_v33 = vld [vmem:[#allocation2 + $0x2] sm:$0xff] }
 0x230   : > { %v834_v39 = vmul.f32 %v833_v31, %v828_v33 }
 0x231   : > { %v826_v37 = vadd.f32 %v824_v30, %v816_v29 }
 0x233   : > { %v836_v40 = vadd.f32 %v834_v39, %v826_v37 }
 0x234   : > { %v819_v32 = vld [vmem:[#allocation2 + $0x9] sm:$0xff] }
 0x235   : > { %v829_v34 = vld [vmem:[#allocation2 + $0xa] sm:$0xff]  ;;  %v825_v36 = vmul.f32 %v823_v25, %v819_v32 }
 0x236   : > { %v835_v5 = vmul.f32 %v833_v31, %v829_v34 }
 0x237   : > { %v827_v38 = vadd.f32 %v825_v36, %v817_v35 }
 0x239   : > { %v837_v41 = vadd.f32 %v835_v5, %v827_v38 }
 0x23b   : > { %v838_v42 = vpack.c.bf16 %v837_v41, %v836_v40 }
 0x23d   : > { %1322 = vmatmul.mubr.bf16.vlgmr.msra.gmra.mrb[0].mxu1 %v838_v42 }
 0x310   : > { %v944_v43 = vpop.f32.mrb[0].mxu1 }
 0x311   : > { %v945_v44 = vadd.f32 %v1233_v11, %v944_v43  ;;  %v1323_v3 = vpop.f32.mrb[1].mxu1 }
 0x312   : > { %v947_v6 = vpop.f32.mrb[2].mxu1 }
 0x313   : > { %v948_v45 = vadd.f32 %v1233_v11, %v947_v6  ;;  %v1324_v46 = vpop.f32.mrb[3].mxu1  ;;  %v951_v47 = vmax.f32 %v945_v44, 0.0 }
 0x315   : > { %v952_v48 = vmax.f32 %v948_v45, 0.0 }
 0x317   : > { %v1263_v49 = vpack.c.bf16 %v952_v48, %v951_v47 }
 0x319   : > { %1264 = vst [vmem:[%s553_s22] sm:$0xff] %v1263_v49  }
 0x320   : > { %v973_v50 = vld [vmem:[%s553_s22] sm:$0xf]  ;;  %v974_v51 = vld [vmem:[%s553_s22 + $0x4] sm:$0xf] }
 0x321   : > { %v983_v52 = vsel %vm981_vm6, %v973_v50, 0  ;;  %v984_v53 = vsel %vm981_vm6, %v974_v51, 0 }
 0x322   : > { %985 = vst [vmem:[%s553_s22] sm:$0xf] %v983_v52  ;;  %986 = vst [vmem:[%s553_s22 + $0x4] sm:$0xf] %v984_v53 }
 0x323   : > { %1752 = shalt.err (!%p1749_p2)
}
 0x324   : > { %s1753_s28 = scalar_lea.hbm %s2300_s26, 128  ;;  %s1757_s12 = scalar_lea.hbm %s2436_s9, 256 }
 0x325   : > { %p1754_p8 = scmp.ne.s32.totalorder %s2300_s26, %s1753_s28  ;;  %p1758_p12 = scmp.lt.u32.totalorder %s2300_s26, %s2436_s9 }
 0x326   : > { %p1759_p13 = scmp.lt.u32.totalorder %s1757_s12, %s1753_s28  ;;  %p1761_p4 = scmp.lt.u32.totalorder %s1753_s28, %s2300_s26 }
 0x327   : > { %p1755_p9 = pnand %p1754_p8, %p2437_p11 }
 0x328   : > { %p1760_p6 = por %p1759_p13, %p1758_p12 }
 0x329   : > { %p1756_p3 = pneg %p1755_p9 }
 0x32a   : > { %p1762_p1 = por %p1761_p4, %p1760_p6 }
 0x32c   : > { %p1763_p7 = pnand %p1762_p1, %p1756_p3 }
 0x32e   : > { %1766 = shalt.err (!%p1763_p7)
}
 0x32f   : > { %s1854_s27 = smov 64   ;;  %s1855_s3 = smov 4  }
 0x330   : > { %1355 = dma.vmem_to_hbm [thread:$0]  (%p2437_p11), %s2302_s21, 128, %s2300_s26, %s988_s20, %s1854_s27, %s1854_s27, %s1855_s3  }
 0x331 PF: > { %s2438_s24 = sld [smem:[#allocation25_spill]]  ;;  %s2439_s29 = sld [smem:[#allocation34_spill]] }
 0x332   : > { %s2440_s19 = sld [smem:[#allocation29_spill]] }
 0x337   : > { %s1018_s22 = sand.u32 1, %s2438_s24   ;;  %p2441_p0 = scmp.ne.s32.totalorder %s2439_s29, 0 }
 0x338   : > { %p2442_p5 = scmp.ge.s32.totalorder %s2440_s19, 2  ;;  %s1019_s15 = scalar_lea.sflag [#allocation5], %s1018_s22 }
 0x33a   : > { %p1387_p10 = pnand %p2442_p5, %p2441_p0 }
 0x33c   : > { %1812 = dma.done.wait (!%p1387_p10), %s1019_s15, 128  }
 0x33d   : > { %1814 = vsyncadd (!%p1387_p10), %s1019_s15, 4294967168  ;;  %s31_s14 = sadd.s32 1, %s2440_s19   ;;  %s2443_s7 = sld [smem:[#allocation26_spill]] }
 0x33e   : > { %p28_p2 = scmp.ge.s32.totalorder %s31_s14, 4   ;;  %s2444_s11 = sld [smem:[#allocation33_spill]] }
 0x33f   : > { %s2445_s12 = sld [smem:[#allocation28_spill]]  ;;  %s2446_s13 = sld [smem:[#allocation31_spill]] }
 0x340   : > { %s2447_s30 = smov %s1821_s10  ;;  %30 = sbr.rel (!%p28_p2) target bundleno = 17 (0x11), region = 157 }
 0x343   : > { %s2448_s10 = smov %s2443_s7 }
 0x347   :  { %1024 = vsyncpa [#allocation4], 1 }
 0x348   :  { %1026 = vsyncpa [#allocation4 + $0x1], 1 }
 0x349   :  { %1027 = vsyncpa [#allocation7], 1 }
 0x34a   :  { %1029 = vsyncpa [#allocation7 + $0x1], 1 }
 0x34b   :  { %1030 = vsyncpa [#allocation10], 1 }
 0x34c   :  { %1031 = vsyncpa [#allocation13], 1 }
 0x34d   :  { %1032 = vsyncpa [#allocation16], 1 }
 0x34e   :  { %1033 = vsyncpa [#allocation5], 1 }
 0x34f   :  { %1035 = vsyncpa [#allocation5 + $0x1], 1 }

</bundles_post_ra>
